<compile_context>
chip_gen: v7x
topology: tpu7x:2x2x1
jax: 0.10.0
libtpu: 0.0.40
codegen_flags: <defaults>
</compile_context>

<pallas_src>
import functools

import jax
import jax.numpy as jnp
from jax.experimental import pallas as pl
from jax.experimental.pallas import tpu as pltpu


def _affine_kernel(x_ref, w1a_ref, b1_ref, w2t_ref, b2_ref, w3_ref, scal_ref,
                   xout_ref, ls_ref, *, left, reverse):
    # x_ref: (2, TB) with batch on lanes. Row `act` is the conditioning
    # (masked-in) channel, row `pas` is the channel being transformed.
    act = 0 if left else 1
    pas = 1 - act

    x = x_ref[...]                           # (2, TB) f32
    x_act = x[act:act + 1, :]                # (1, TB)
    x_pas = x[pas:pas + 1, :]                # (1, TB)

    # Layer 1: Linear(2, H). The mask zeroes one input feature, so this is a
    # single rank-1 broadcast FMA on the VPU (no K=2 MXU latency).
    h1 = w1a_ref[...] * x_act + b1_ref[...]  # (H,1)*(1,TB)+(H,1) -> (H, TB)

    # Layer 2: Linear(H, H) on the MXU, N = TB fills the lanes, then ReLU.
    h2 = jnp.dot(w2t_ref[...], h1, preferred_element_type=jnp.float32) + b2_ref[...]
    h2 = jnp.maximum(h2, 0.0)                # (H, TB)

    # Layer 3: Linear(H, 2) as two VPU rank-1 contractions + sublane reduce
    # (avoids an N=2 MXU op and the lane-slicing of an MXU result).
    w3 = w3_ref[...]                         # (H, 2)
    b3_ls = scal_ref[0]
    b3_sh = scal_ref[1]
    scale_scale = scal_ref[2]
    shift_scale = scal_ref[3]

    ls_pre = jnp.sum(w3[:, 0:1] * h2, axis=0, keepdims=True) + b3_ls   # (1, TB)
    shift = jnp.sum(w3[:, 1:2] * h2, axis=0, keepdims=True) + b3_sh    # (1, TB)

    log_scale = jnp.tanh(ls_pre) * scale_scale + shift_scale           # (1, TB)

    if reverse:
        x_new = (x_pas - shift) * jnp.exp(-log_scale)
    else:
        x_new = x_pas * jnp.exp(log_scale) + shift

    zero = jnp.zeros_like(log_scale)
    if left:
        xout_ref[...] = jnp.concatenate([x_act, x_new], axis=0)
        ls_ref[...] = jnp.concatenate([zero, log_scale], axis=0)
    else:
        xout_ref[...] = jnp.concatenate([x_new, x_act], axis=0)
        ls_ref[...] = jnp.concatenate([log_scale, zero], axis=0)


def affine_transform_2d(x, params, *, left=True, reverse=False, block_b=1024):
    """Forward pass of AffineTransform2D. x: (B, 2) float32. Returns (x_out, log_scale)."""
    w1, b1, w2, b2, w3, b3, ss, sh = params
    B = x.shape[0]
    H = w1.shape[1]
    act = 0 if left else 1

    # Lane-dense batch tile: multiple of 128, capped at block_b, pad B up to it.
    TB = min(block_b, pl.cdiv(B, 128) * 128)
    Bp = pl.cdiv(B, TB) * TB
    xT = jnp.pad(x.T, ((0, 0), (0, Bp - B))).astype(jnp.float32)   # (2, Bp)

    # Re-layout weights for the (feature, batch) kernel dataflow.
    w1a = w1[act].reshape(H, 1)          # active input column of Linear(2,H)
    b1t = b1.reshape(H, 1)
    w2t = w2.T                           # (out, in) so layer 2 is w2t @ h1
    b2t = b2.reshape(H, 1)
    scalars = jnp.concatenate(
        [b3.reshape(-1), ss.reshape(-1), sh.reshape(-1)]).astype(jnp.float32)  # (4,)

    kernel = functools.partial(_affine_kernel, left=left, reverse=reverse)
    const = lambda shape: pl.BlockSpec(shape, lambda i, _s=shape: (0,) * len(_s))
    batched = pl.BlockSpec((2, TB), lambda i: (0, i))

    xoT, lsT = pl.pallas_call(
        kernel,
        out_shape=(jax.ShapeDtypeStruct((2, Bp), jnp.float32),
                   jax.ShapeDtypeStruct((2, Bp), jnp.float32)),
        grid=(Bp // TB,),
        in_specs=[
            batched,                                            # x (2, TB) tile
            const((H, 1)),                                      # w1 active column
            const((H, 1)),                                      # b1
            const((H, H)),                                      # w2^T
            const((H, 1)),                                      # b2
            const((H, 2)),                                      # w3
            pl.BlockSpec(memory_space=pltpu.MemorySpace.SMEM),  # b3, ss, sh scalars
        ],
        out_specs=(batched, batched),
        compiler_params=pltpu.CompilerParams(
            dimension_semantics=("parallel",)),
    )(xT, w1a, b1t, w2t, b2t, w3, scalars)

    return xoT[:, :B].T, lsT[:, :B].T


def init_params(key, hidden_size=64):
    """Deterministic params matching MLP(2, H, num_hidden_layers=2, 2).

    Linear weights stored as (in_features, out_features); biases row vectors.
    """
    H = hidden_size
    ks = jax.random.split(key, 6)

    def u(k, shape, fan_in):
        bound = 1.0 / jnp.sqrt(fan_in)
        return jax.random.uniform(k, shape, jnp.float32, -bound, bound)

    w1 = u(ks[0], (2, H), 2.0)
    b1 = u(ks[1], (1, H), 2.0)
    w2 = u(ks[2], (H, H), float(H))
    b2 = u(ks[3], (1, H), float(H))
    w3 = u(ks[4], (H, 2), float(H))
    b3 = u(ks[5], (2,), float(H))
    # __init__ sets these to zeros; use small nonzero values (deterministic)
    # so the tanh/exp path actually affects the output.
    scale_scale = jnp.full((1,), 0.5, dtype=jnp.float32)
    shift_scale = jnp.full((1,), 0.1, dtype=jnp.float32)
    return (w1, b1, w2, b2, w3, b3, scale_scale, shift_scale)


def reference(x, params, *, left=True, reverse=False):
    """Plain-JAX reference of the PyTorch forward, for validation."""
    w1, b1, w2, b2, w3, b3, ss, sh = params
    mask = jnp.array([[1.0, 0.0]] if left else [[0.0, 1.0]], dtype=jnp.float32)
    xm = x * mask
    h1 = xm @ w1 + b1
    h2 = jnp.maximum(h1 @ w2 + b2, 0.0)
    out = h2 @ w3 + b3
    log_scale, shift = out[:, 0:1], out[:, 1:2]
    log_scale = jnp.tanh(log_scale) * ss[0] + sh[0]
    inv_mask = 1.0 - mask
    shift = shift * inv_mask
    log_scale = log_scale * inv_mask
    if reverse:
        x_out = (x - shift) * jnp.exp(-log_scale)
    else:
        x_out = x * jnp.exp(log_scale) + shift
    return x_out, log_scale


if __name__ == "__main__":
    key = jax.random.PRNGKey(0)
    kx, kp = jax.random.split(key)

    B, H = 8, 64
    x = jax.random.normal(kx, (B, 2), dtype=jnp.float32)
    params = init_params(kp, hidden_size=H)

    for left in (True, False):
        for reverse in (False, True):
            x_out, log_scale = affine_transform_2d(x, params, left=left, reverse=reverse)
            jax.block_until_ready((x_out, log_scale))
            x_ref, ls_ref = reference(x, params, left=left, reverse=reverse)
            assert jnp.allclose(x_out, x_ref, atol=1e-5, rtol=1e-5), (left, reverse)
            assert jnp.allclose(log_scale, ls_ref, atol=1e-5, rtol=1e-5), (left, reverse)

    # coupling layer invertibility sanity check
    y, _ = affine_transform_2d(x, params, left=True, reverse=False)
    x_rec, _ = affine_transform_2d(y, params, left=True, reverse=True)
    assert jnp.allclose(x_rec, x, atol=1e-5, rtol=1e-5)

    # TODO(synk): when stacking several coupling layers (full RealNVP), fuse them
    # into one pallas_call to amortize launch/step overhead and keep weights resident.
    print("KERNEL_OK")
</pallas_src>

<mosaic_0001>
module attributes {stable_mosaic.version = 11 : i64} {
  func.func @_affine_kernel(%arg0: i32, %arg1: memref<2x128xf32, #tpu.memory_space<vmem>>, %arg2: memref<64x1xf32, #tpu.memory_space<vmem>>, %arg3: memref<64x1xf32, #tpu.memory_space<vmem>>, %arg4: memref<64x64xf32, #tpu.memory_space<vmem>>, %arg5: memref<64x1xf32, #tpu.memory_space<vmem>>, %arg6: memref<64x2xf32, #tpu.memory_space<vmem>>, %arg7: memref<4xf32, #tpu.memory_space<smem>>, %arg8: memref<2x128xf32, #tpu.memory_space<vmem>>, %arg9: memref<2x128xf32, #tpu.memory_space<vmem>>) attributes {dimension_semantics = [#tpu.dimension_semantics<parallel>], iteration_bounds = array<i64: 1>, scalar_prefetch = 0 : i64, scratch_operands = 0 : i64, tpu.core_type = #tpu.core_type<tc>, window_params = [{transform_indices = @transform_0, window_bounds = array<i64: 2, 128>}, {pipeline_mode = #tpu.pipeline_mode<synchronous>, transform_indices = @transform_1, window_bounds = array<i64: 64, 1>}, {pipeline_mode = #tpu.pipeline_mode<synchronous>, transform_indices = @transform_2, window_bounds = array<i64: 64, 1>}, {pipeline_mode = #tpu.pipeline_mode<synchronous>, transform_indices = @transform_3, window_bounds = array<i64: 64, 64>}, {pipeline_mode = #tpu.pipeline_mode<synchronous>, transform_indices = @transform_4, window_bounds = array<i64: 64, 1>}, {pipeline_mode = #tpu.pipeline_mode<synchronous>, transform_indices = @transform_5, window_bounds = array<i64: 64, 2>}, {transform_indices = @transform_6, window_bounds = array<i64: 4>}, {transform_indices = @transform_7, window_bounds = array<i64: 2, 128>}, {transform_indices = @transform_8, window_bounds = array<i64: 2, 128>}]} {
    %c0 = arith.constant 0 : index
    %c0_0 = arith.constant 0 : index
    %0 = vector.load %arg1[%c0, %c0_0] : memref<2x128xf32, #tpu.memory_space<vmem>>, vector<2x128xf32>
    %1 = vector.extract_strided_slice %0 {offsets = [0, 0], sizes = [1, 128], strides = [1, 1]} : vector<2x128xf32> to vector<1x128xf32>
    %2 = vector.extract_strided_slice %0 {offsets = [1, 0], sizes = [1, 128], strides = [1, 1]} : vector<2x128xf32> to vector<1x128xf32>
    %c0_1 = arith.constant 0 : index
    %c0_2 = arith.constant 0 : index
    %3 = vector.load %arg2[%c0_1, %c0_2] : memref<64x1xf32, #tpu.memory_space<vmem>>, vector<64x1xf32>
    %4 = vector.broadcast %3 : vector<64x1xf32> to vector<64x128xf32>
    %5 = vector.broadcast %1 : vector<1x128xf32> to vector<64x128xf32>
    %6 = arith.mulf %4, %5 : vector<64x128xf32>
    %c0_3 = arith.constant 0 : index
    %c0_4 = arith.constant 0 : index
    %7 = vector.load %arg3[%c0_3, %c0_4] : memref<64x1xf32, #tpu.memory_space<vmem>>, vector<64x1xf32>
    %8 = vector.broadcast %7 : vector<64x1xf32> to vector<64x128xf32>
    %9 = arith.addf %6, %8 : vector<64x128xf32>
    %c0_5 = arith.constant 0 : index
    %c0_6 = arith.constant 0 : index
    %10 = vector.load %arg4[%c0_5, %c0_6] : memref<64x64xf32, #tpu.memory_space<vmem>>, vector<64x64xf32>
    %cst = arith.constant dense<0.000000e+00> : vector<64x128xf32>
    %11 = tpu.matmul %10, %9, %cst {dimension_numbers = #tpu.dot_dimension_numbers<[1], [0], [0], [1], [0, 0, 1, 1], [], []>} : vector<64x64xf32>, vector<64x128xf32>, vector<64x128xf32> -> vector<64x128xf32>
    %c0_7 = arith.constant 0 : index
    %c0_8 = arith.constant 0 : index
    %12 = vector.load %arg5[%c0_7, %c0_8] : memref<64x1xf32, #tpu.memory_space<vmem>>, vector<64x1xf32>
    %13 = vector.broadcast %12 : vector<64x1xf32> to vector<64x128xf32>
    %14 = arith.addf %11, %13 : vector<64x128xf32>
    %cst_9 = arith.constant 0.000000e+00 : f32
    %15 = vector.broadcast %cst_9 : f32 to vector<64x128xf32>
    %16 = arith.maximumf %14, %15 : vector<64x128xf32>
    %c0_10 = arith.constant 0 : index
    %c0_11 = arith.constant 0 : index
    %17 = vector.load %arg6[%c0_10, %c0_11] : memref<64x2xf32, #tpu.memory_space<vmem>>, vector<64x2xf32>
    %c0_12 = arith.constant 0 : index
    %18 = memref.load %arg7[%c0_12] : memref<4xf32, #tpu.memory_space<smem>>
    %c1 = arith.constant 1 : index
    %19 = memref.load %arg7[%c1] : memref<4xf32, #tpu.memory_space<smem>>
    %c2 = arith.constant 2 : index
    %20 = memref.load %arg7[%c2] : memref<4xf32, #tpu.memory_space<smem>>
    %c3 = arith.constant 3 : index
    %21 = memref.load %arg7[%c3] : memref<4xf32, #tpu.memory_space<smem>>
    %22 = vector.extract_strided_slice %17 {offsets = [0, 0], sizes = [64, 1], strides = [1, 1]} : vector<64x2xf32> to vector<64x1xf32>
    %23 = vector.broadcast %22 : vector<64x1xf32> to vector<64x128xf32>
    %24 = arith.mulf %23, %16 : vector<64x128xf32>
    %cst_13 = arith.constant dense<0.000000e+00> : vector<128xf32>
    %25 = vector.multi_reduction <add>, %24, %cst_13 [0] : vector<64x128xf32> to vector<128xf32>
    %26 = vector.shape_cast %25 : vector<128xf32> to vector<1x128xf32>
    %27 = vector.broadcast %18 : f32 to vector<1x128xf32>
    %28 = arith.addf %26, %27 : vector<1x128xf32>
    %29 = vector.extract_strided_slice %17 {offsets = [0, 1], sizes = [64, 1], strides = [1, 1]} : vector<64x2xf32> to vector<64x1xf32>
    %30 = vector.broadcast %29 : vector<64x1xf32> to vector<64x128xf32>
    %31 = arith.mulf %30, %16 : vector<64x128xf32>
    %cst_14 = arith.constant dense<0.000000e+00> : vector<128xf32>
    %32 = vector.multi_reduction <add>, %31, %cst_14 [0] : vector<64x128xf32> to vector<128xf32>
    %33 = vector.shape_cast %32 : vector<128xf32> to vector<1x128xf32>
    %34 = vector.broadcast %19 : f32 to vector<1x128xf32>
    %35 = arith.addf %33, %34 : vector<1x128xf32>
    %36 = math.tanh %28 : vector<1x128xf32>
    %37 = vector.broadcast %20 : f32 to vector<1x128xf32>
    %38 = arith.mulf %36, %37 : vector<1x128xf32>
    %39 = vector.broadcast %21 : f32 to vector<1x128xf32>
    %40 = arith.addf %38, %39 : vector<1x128xf32>
    %41 = math.exp %40 : vector<1x128xf32>
    %42 = arith.mulf %2, %41 : vector<1x128xf32>
    %43 = arith.addf %42, %35 : vector<1x128xf32>
    %cst_15 = arith.constant 0.000000e+00 : f32
    %44 = vector.broadcast %cst_15 : f32 to vector<1x128xf32>
    %45 = tpu.concatenate %1, %43 in 0 : vector<1x128xf32>, vector<1x128xf32> -> vector<2x128xf32>
    %c0_16 = arith.constant 0 : index
    %c0_17 = arith.constant 0 : index
    %46 = vector.load %arg8[%c0_16, %c0_17] : memref<2x128xf32, #tpu.memory_space<vmem>>, vector<2x128xf32>
    tpu.vector_store %arg8[%c0_16, %c0_17], %45 {strides = array<i32>} : memref<2x128xf32, #tpu.memory_space<vmem>>, vector<2x128xf32>,
    %47 = tpu.concatenate %44, %40 in 0 : vector<1x128xf32>, vector<1x128xf32> -> vector<2x128xf32>
    %c0_18 = arith.constant 0 : index
    %c0_19 = arith.constant 0 : index
    %48 = vector.load %arg9[%c0_18, %c0_19] : memref<2x128xf32, #tpu.memory_space<vmem>>, vector<2x128xf32>
    tpu.vector_store %arg9[%c0_18, %c0_19], %47 {strides = array<i32>} : memref<2x128xf32, #tpu.memory_space<vmem>>, vector<2x128xf32>,
    return
  }
  func.func @transform_0(%arg0: i32) -> (i32, i32) {
    %c0_i32 = arith.constant 0 : i32
    %c0_i32_0 = arith.constant 0 : i32
    return %c0_i32, %arg0 : i32, i32
  }
  func.func @transform_1(%arg0: i32) -> (i32, i32) {
    %c0_i32 = arith.constant 0 : i32
    %c0_i32_0 = arith.constant 0 : i32
    %c0_i32_1 = arith.constant 0 : i32
    return %c0_i32, %c0_i32_0 : i32, i32
  }
  func.func @transform_2(%arg0: i32) -> (i32, i32) {
    %c0_i32 = arith.constant 0 : i32
    %c0_i32_0 = arith.constant 0 : i32
    %c0_i32_1 = arith.constant 0 : i32
    return %c0_i32, %c0_i32_0 : i32, i32
  }
  func.func @transform_3(%arg0: i32) -> (i32, i32) {
    %c0_i32 = arith.constant 0 : i32
    %c0_i32_0 = arith.constant 0 : i32
    %c0_i32_1 = arith.constant 0 : i32
    return %c0_i32, %c0_i32_0 : i32, i32
  }
  func.func @transform_4(%arg0: i32) -> (i32, i32) {
    %c0_i32 = arith.constant 0 : i32
    %c0_i32_0 = arith.constant 0 : i32
    %c0_i32_1 = arith.constant 0 : i32
    return %c0_i32, %c0_i32_0 : i32, i32
  }
  func.func @transform_5(%arg0: i32) -> (i32, i32) {
    %c0_i32 = arith.constant 0 : i32
    %c0_i32_0 = arith.constant 0 : i32
    %c0_i32_1 = arith.constant 0 : i32
    return %c0_i32, %c0_i32_0 : i32, i32
  }
  func.func @transform_6(%arg0: i32) -> i32 {
    %c0_i32 = arith.constant 0 : i32
    %c0_i32_0 = arith.constant 0 : i32
    return %c0_i32 : i32
  }
  func.func @transform_7(%arg0: i32) -> (i32, i32) {
    %c0_i32 = arith.constant 0 : i32
    %c0_i32_0 = arith.constant 0 : i32
    return %c0_i32, %arg0 : i32, i32
  }
  func.func @transform_8(%arg0: i32) -> (i32, i32) {
    %c0_i32 = arith.constant 0 : i32
    %c0_i32_0 = arith.constant 0 : i32
    return %c0_i32, %arg0 : i32, i32
  }
}

</mosaic_0001>

<bundles_post_ra>
// kernel: tpu_custom_call.1
= control target key start
LH: loop header
LB: loop body
LE: loop exit
PB: predicated region body
PF: predicated region fallthrough
CT: control target
= control target key end

     0   :  { %14 = vsyncpa [#allocation4], 0  ;;  %s896_s0 = inlined_call_operand.vmem [shape: f32[2,128], index: 0, kind: input, shape index: {}]   ;;  %s897_s1 = inlined_call_operand.vmem [shape: f32[64,1], index: 1, kind: input, shape index: {}]   ;;  %s898_s2 = inlined_call_operand.vmem [shape: f32[64,1], index: 2, kind: input, shape index: {}]   ;;  %s899_s3 = inlined_call_operand.vmem [shape: f32[64,64], index: 3, kind: input, shape index: {}]   ;;  %s900_s4 = inlined_call_operand.vmem [shape: f32[64,1], index: 4, kind: input, shape index: {}]   ;;  %s901_s5 = inlined_call_operand.vmem [shape: f32[64,2], index: 5, kind: input, shape index: {}]   ;;  %s902_s6 = inlined_call_operand.vmem [shape: f32[4], index: 6, kind: input, shape index: {}]   ;;  %s903_s7 = inlined_call_operand.hbm [shape: f32[2,128], index: 7, kind: output, shape index: {0}]   ;;  %s904_s8 = inlined_call_operand.hbm [shape: f32[2,128], index: 8, kind: output, shape index: {1}]  }
   0x1   :  { %15 = vsyncpa [#allocation3], 0 }
   0x2   :  { %16 = vsyncpa [#allocation7], 0  ;;  %s35_s29 = sshll.u32 %s902_s6, 4  ;;  %s36_s29 = int_to_ptr.vmem [resolvable:$true] %s35_s29 }
   0x3   :  { %s619_s30 = scalar_lea.vmem %s36_s29, 16  ;;  %p624_p1 = scmp.lt.s32.totalorder %s36_s29, %s36_s29 }
   0x4   :  { %p620_p0 = scmp.ne.s32.totalorder %s36_s29, %s619_s30  ;;  %p625_p2 = scmp.lt.s32.totalorder %s619_s30, %s619_s30 }
   0x6   :  { %p626_p3 = por %p625_p2, %p624_p1 }
   0x8   :  { %p627_p4 = pnand %p626_p3, %p620_p0 }
   0xa   :  { %630 = shalt.err (!%p627_p4)
}
   0xb   :  { %s681_s9 = smov [#allocation2]  }
   0xc   :  { %38 = dma.vmem_to_smem %s36_s29, 16, %s681_s9, [#allocation4]  }
   0xd   :  { %675 = dma.done.wait [#allocation4], 16  }
   0xe   :  { %676 = vsyncadd [#allocation4], 4294967280 }
   0xf   :  { %42 = sfence }
  0x10   :  { %v104_v0 = vld [vmem:[%s898_s2] sm:$0xff]  ;;  %v682_v2 = vmov 0   ;;  %v105_v3 = vld [vmem:[%s898_s2 + $0x8] sm:$0xff]  ;;  %v47_v5 = vld [vmem:[%s897_s1 + $0x18] sm:$0xff]  ;;  %vm216_vm0 = vcmask 523264   ;;  %v683_v35 = vmov 1   ;;  %v92_v36 = vlaneseq }
  0x11   :  { %v44_v1 = vld [vmem:[%s897_s1] sm:$0xff]  ;;  %612 = vset.pattern.permute.xlu1 %v682_v2  ;;  %611 = vset.pattern.permute.xlu0 %v682_v2  ;;  %v45_v4 = vld [vmem:[%s897_s1 + $0x8] sm:$0xff]  ;;  %v46_v6 = vld [vmem:[%s897_s1 + $0x10] sm:$0xff]  ;;  %s536_s15 = sld [smem:[#allocation2 + $0x2]]  ;;  %s537_s16 = sld [smem:[#allocation2 + $0x3]]  ;;  %vm493_vm1 = vcmask 1040384  }
  0x12   :  { %114 = vperm.xlu1 %612, %v104_v0   ;;  %54 = vperm.xlu0 %611, %v44_v1   ;;  %v107_v7 = vld [vmem:[%s898_s2 + $0x18] sm:$0xff]  ;;  %v106_v8 = vld [vmem:[%s898_s2 + $0x10] sm:$0xff]  ;;  %v49_v9 = vld [vmem:[%s897_s1 + $0x28] sm:$0xff]  ;;  %v93_v37 = vshrl.u32 %v92_v36, 7  ;;  %s684_s17 = smov [#allocation6]   ;;  %s535_s19 = sld [smem:[#allocation2 + $0x1]] }
  0x13   :  { %v48_v10 = vld [vmem:[%s897_s1 + $0x20] sm:$0xff]  ;;  %v109_v11 = vld [vmem:[%s898_s2 + $0x28] sm:$0xff]  ;;  %v51_v13 = vld [vmem:[%s897_s1 + $0x38] sm:$0xff]  ;;  %s514_s18 = sshll.u32 %s684_s17, 4  ;;  %s515_s18 = int_to_ptr.vmem [resolvable:$true] %s514_s18 }
  0x14   :  { %v108_v12 = vld [vmem:[%s898_s2 + $0x20] sm:$0xff]  ;;  %v50_v14 = vld [vmem:[%s897_s1 + $0x30] sm:$0xff]  ;;  %v111_v15 = vld [vmem:[%s898_s2 + $0x38] sm:$0xff]  ;;  %v94_v38 = vsub.s32 0, %v93_v37  ;;  %s631_s20 = scalar_lea.vmem %s515_s18, 32  ;;  %p636_p6 = scmp.lt.s32.totalorder %s515_s18, %s515_s18 }
  0x15   :  { %v110_v16 = vld [vmem:[%s898_s2 + $0x30] sm:$0xff]  ;;  %v169_v17 = vld [vmem:[%s900_s4 + $0x8] sm:$0xff]  ;;  %v168_v18 = vld [vmem:[%s900_s4] sm:$0xff]  ;;  %p632_p5 = scmp.ne.s32.totalorder %s515_s18, %s631_s20  ;;  %p637_p7 = scmp.lt.s32.totalorder %s631_s20, %s631_s20 }
  0x16   :  { %119 = vperm.xlu1 %612, %v105_v3   ;;  %59 = vperm.xlu0 %611, %v45_v4   ;;  %v171_v19 = vld [vmem:[%s900_s4 + $0x18] sm:$0xff]  ;;  %v170_v20 = vld [vmem:[%s900_s4 + $0x10] sm:$0xff]  ;;  %v160_v21 = vld [vmem:[%s899_s3] sm:$0xff] }
  0x17   :  { %v164_v22 = vld [vmem:[%s899_s3 + $0x20] sm:$0xff]  ;;  %570 = vmatprep.mubr.msk.f32.mxu0 %vm216_vm0, %v160_v21  ;;  %v355_v23 = vld [vmem:[%s901_s5 + $0x8] sm:$0xff]  ;;  %v356_v25 = vld [vmem:[%s901_s5 + $0x10] sm:$0xff]  ;;  %p638_p8 = por %p637_p7, %p636_p6 }
  0x18   :  { %576 = vmatprep.mubr.msk.f32.mxu1 %vm216_vm0, %v164_v22  ;;  %v354_v24 = vld [vmem:[%s901_s5] sm:$0xff]  ;;  %v357_v27 = vld [vmem:[%s901_s5 + $0x18] sm:$0xff]  ;;  %v173_v28 = vld [vmem:[%s900_s4 + $0x28] sm:$0xff] }
  0x19   :  { %v172_v26 = vld [vmem:[%s900_s4 + $0x20] sm:$0xff]  ;;  %v174_v30 = vld [vmem:[%s900_s4 + $0x30] sm:$0xff]  ;;  %v359_v31 = vld [vmem:[%s901_s5 + $0x28] sm:$0xff]  ;;  %p639_p9 = pnand %p638_p8, %p632_p5 }
  0x1a   :  { %69 = vperm.xlu1 %612, %v47_v5   ;;  %64 = vperm.xlu0 %611, %v46_v6   ;;  %v358_v29 = vld [vmem:[%s901_s5 + $0x20] sm:$0xff]  ;;  %v175_v32 = vld [vmem:[%s900_s4 + $0x38] sm:$0xff]  ;;  %v360_v34 = vld [vmem:[%s901_s5 + $0x30] sm:$0xff] }
  0x1b   :  { %v361_v33 = vld [vmem:[%s901_s5 + $0x38] sm:$0xff]  ;;  %v841_v39 = vld [vmem:[%s896_s0] sm:$0x3] }
  0x1c   :  { %v95_v40 = vrot.slane %v841_v39, %v94_v38 }
  0x1e   :  { %129 = vperm.xlu1 %612, %v107_v7   ;;  %124 = vperm.xlu0 %611, %v106_v8  }
  0x22   :  { %79 = vperm.xlu1 %612, %v49_v9   ;;  %74 = vperm.xlu0 %611, %v48_v10  }
  0x26   :  { %139 = vperm.xlu1 %612, %v109_v11   ;;  %134 = vperm.xlu0 %611, %v108_v12  }
  0x2a   :  { %89 = vperm.xlu1 %612, %v51_v13   ;;  %84 = vperm.xlu0 %611, %v50_v14   ;;  %v161_v13 = vld [vmem:[%s899_s3 + $0x8] sm:$0xff] }
  0x2b   :  { %v165_v14 = vld [vmem:[%s899_s3 + $0x28] sm:$0xff] }
  0x2e   :  { %149 = vperm.xlu1 %612, %v111_v15   ;;  %144 = vperm.xlu0 %611, %v110_v16   ;;  %v162_v15 = vld [vmem:[%s899_s3 + $0x10] sm:$0xff] }
  0x2f   :  { %v166_v16 = vld [vmem:[%s899_s3 + $0x30] sm:$0xff] }
  0x32   :  { %183 = vperm.xlu1 %612, %v169_v17   ;;  %178 = vperm.xlu0 %611, %v168_v18   ;;  %v163_v17 = vld [vmem:[%s899_s3 + $0x18] sm:$0xff] }
  0x33   :  { %v167_v18 = vld [vmem:[%s899_s3 + $0x38] sm:$0xff]  ;;  %s362_s3 = sld [smem:[#allocation2]] }
  0x36   :  { %193 = vperm.xlu1 %612, %v171_v19   ;;  %188 = vperm.xlu0 %611, %v170_v20  }
  0x3a   :  { %373 = vperm.xlu1 %612, %v355_v23   ;;  %368 = vperm.xlu0 %611, %v354_v24  }
  0x3e   :  { %378 = vperm.xlu1 %612, %v356_v25   ;;  %198 = vperm.xlu0 %611, %v172_v26  }
  0x42   :  { %383 = vperm.xlu1 %612, %v357_v27   ;;  %203 = vperm.xlu0 %611, %v173_v28  }
  0x46   :  { %388 = vperm.xlu1 %612, %v358_v29   ;;  %208 = vperm.xlu0 %611, %v174_v30  }
  0x4a   :  { %393 = vperm.xlu1 %612, %v359_v31   ;;  %213 = vperm.xlu0 %611, %v175_v32  }
  0x4e   :  { %403 = vperm.xlu1 %612, %v361_v33   ;;  %398 = vperm.xlu0 %611, %v360_v34  }
  0x52   :  { %613 = vset.pattern.permute.xlu0 %v683_v35  ;;  %614 = vset.pattern.permute.xlu1 %v683_v35 }
  0x53   :  { %430 = vperm.xlu0 %613, %v354_v24   ;;  %434 = vperm.xlu1 %614, %v355_v23  }
  0x57   :  { %442 = vperm.xlu0 %613, %v357_v27   ;;  %438 = vperm.xlu1 %614, %v356_v25  }
  0x5b   :  { %450 = vperm.xlu0 %613, %v359_v31   ;;  %446 = vperm.xlu1 %614, %v358_v29  }
  0x5f   :  { %458 = vperm.xlu0 %613, %v361_v33   ;;  %454 = vperm.xlu1 %614, %v360_v34  }
  0x91   :  { %v115_v41 = vpop.permute.xlu1 %114  ;;  %v55_v42 = vpop.permute.xlu0 %54 }
  0x92   :  { %v96_v43 = vmul.f32 %v95_v40, %v55_v42 }
  0x94   :  { %v152_v47 = vadd.f32 %v115_v41, %v96_v43 }
  0x95   :  { %v120_v44 = vpop.permute.xlu1 %119  ;;  %v60_v45 = vpop.permute.xlu0 %59 }
  0x96   :  { %v97_v46 = vmul.f32 %v95_v40, %v60_v45 }
  0x98   :  { %v153_v48 = vadd.f32 %v120_v44, %v97_v46 }
  0x99   :  { %v70_v49 = vpop.permute.xlu1 %69  ;;  %v65_v50 = vpop.permute.xlu0 %64 }
  0x9a   :  { %v582_v51 = vpack.c.bf16 %v153_v48, %v152_v47  ;;  %v99_v52 = vmul.f32 %v95_v40, %v70_v49  ;;  %v98_v53 = vmul.f32 %v95_v40, %v65_v50 }
  0x9c   :  { %583 = vmatprep.subr.bf16.mxu0 %v582_v51  ;;  %598 = vmatprep.subr.bf16.mxu1 %v582_v51 }
  0x9d   :  { %v130_v54 = vpop.permute.xlu1 %129  ;;  %v125_v55 = vpop.permute.xlu0 %124  ;;  %585 = vmatpush3.bf16.msra.mxu0 %v582_v51  ;;  %602 = vmatpush3.bf16.msra.mxu1 %v582_v51 }
  0x9e   :  { %v155_v56 = vadd.f32 %v130_v54, %v99_v52  ;;  %v154_v57 = vadd.f32 %v125_v55, %v98_v53 }
  0xa0   :  { %v586_v58 = vpack.c.bf16 %v155_v56, %v154_v57 }
  0xa1   :  { %v80_v59 = vpop.permute.xlu1 %79  ;;  %v75_v60 = vpop.permute.xlu0 %74 }
  0xa2   :  { %587 = vmatprep.subr.bf16.mxu0 %v586_v58  ;;  %599 = vmatprep.subr.bf16.mxu1 %v586_v58  ;;  %v101_v61 = vmul.f32 %v95_v40, %v80_v59  ;;  %v100_v62 = vmul.f32 %v95_v40, %v75_v60 }
  0xa3   :  { %589 = vmatpush3.bf16.msra.mxu0 %v586_v58  ;;  %603 = vmatpush3.bf16.msra.mxu1 %v586_v58 }
  0xa5   :  { %v140_v63 = vpop.permute.xlu1 %139  ;;  %v135_v0 = vpop.permute.xlu0 %134 }
  0xa6   :  { %v157_v1 = vadd.f32 %v140_v63, %v101_v61  ;;  %v156_v2 = vadd.f32 %v135_v0, %v100_v62 }
  0xa8   :  { %v590_v3 = vpack.c.bf16 %v157_v1, %v156_v2 }
  0xa9   :  { %v90_v4 = vpop.permute.xlu1 %89  ;;  %v85_v5 = vpop.permute.xlu0 %84 }
  0xaa   :  { %591 = vmatprep.subr.bf16.mxu0 %v590_v3  ;;  %600 = vmatprep.subr.bf16.mxu1 %v590_v3  ;;  %v103_v6 = vmul.f32 %v95_v40, %v90_v4  ;;  %v102_v7 = vmul.f32 %v95_v40, %v85_v5 }
  0xab   :  { %593 = vmatpush3.bf16.msra.mxu0 %v590_v3  ;;  %604 = vmatpush3.bf16.msra.mxu1 %v590_v3 }
  0xad   :  { %v150_v8 = vpop.permute.xlu1 %149  ;;  %v145_v9 = vpop.permute.xlu0 %144 }
  0xae   :  { %v159_v10 = vadd.f32 %v150_v8, %v103_v6  ;;  %v158_v11 = vadd.f32 %v145_v9, %v102_v7 }
  0xb0   :  { %v594_v12 = vpack.c.bf16 %v159_v10, %v158_v11 }
  0xb1   :  { %v184_v19 = vpop.permute.xlu1 %183  ;;  %v179_v20 = vpop.permute.xlu0 %178 }
  0xb2   :  { %595 = vmatprep.subr.bf16.mxu0 %v594_v12  ;;  %601 = vmatprep.subr.bf16.mxu1 %v594_v12 }
  0xb3   :  { %597 = vmatpush3.bf16.msra.mxu0 %v594_v12  ;;  %605 = vmatpush3.bf16.msra.mxu1 %v594_v12 }
  0xb5   :  { %v194_v21 = vpop.permute.xlu1 %193  ;;  %v189_v22 = vpop.permute.xlu0 %188 }
  0xb6   :  { %571 = vmatmul.mubr.msk.f32.vlgmr.msra.gmra.mrb[0].mxu0 %vm216_vm0, %v161_v13  ;;  %577 = vmatmul.mubr.msk.f32.vlgmr.msra.gmra.mrb[0].mxu1 %vm216_vm0, %v165_v14 }
  0xb7   :  { %573 = vmatprep.mubr.msk.f32.mxu0 %vm216_vm0, %v162_v15  ;;  %579 = vmatprep.mubr.msk.f32.mxu1 %vm216_vm0, %v166_v16 }
  0xb9   :  { %v374_v23 = vpop.permute.xlu1 %373  ;;  %v369_v24 = vpop.permute.xlu0 %368 }
  0xba   :  { %574 = vmatmul.mubr.msk.f32.gmra.mrb[2].mxu0 %vm216_vm0, %v163_v17  ;;  %580 = vmatmul.mubr.msk.f32.gmra.mrb[2].mxu1 %vm216_vm0, %v167_v18 }
  0xbd   :  { %v379_v25 = vpop.permute.xlu1 %378  ;;  %v199_v26 = vpop.permute.xlu0 %198 }
  0xc1   :  { %v384_v27 = vpop.permute.xlu1 %383  ;;  %v204_v28 = vpop.permute.xlu0 %203 }
  0xc5   :  { %v389_v29 = vpop.permute.xlu1 %388  ;;  %v209_v30 = vpop.permute.xlu0 %208 }
  0xc9   :  { %v394_v31 = vpop.permute.xlu1 %393  ;;  %v214_v32 = vpop.permute.xlu0 %213 }
  0xcd   :  { %v404_v33 = vpop.permute.xlu1 %403  ;;  %v399_v34 = vpop.permute.xlu0 %398 }
  0xd2   :  { %v435_v35 = vpop.permute.xlu1 %434  ;;  %v431_v36 = vpop.permute.xlu0 %430 }
  0xd6   :  { %v439_v45 = vpop.permute.xlu1 %438  ;;  %v443_v53 = vpop.permute.xlu0 %442 }
  0xda   :  { %v447_v1 = vpop.permute.xlu1 %446  ;;  %v451_v6 = vpop.permute.xlu0 %450 }
  0xde   :  { %v455_v18 = vpop.permute.xlu1 %454 }
 0x189   :  { %v572_v37 = vpop.f32.mrb[0].mxu0  ;;  %v578_v38 = vpop.f32.mrb[0].mxu1 }
 0x18a   :  { %v313_v40 = vadd.f32 %v572_v37, %v184_v19  ;;  %v307_v41 = vpop.f32.mrb[1].mxu0  ;;  %v327_v42 = vpop.f32.mrb[1].mxu1  ;;  %v333_v59 = vadd.f32 %v578_v38, %v204_v28 }
 0x18b   :  { %v308_v43 = vadd.f32 %v307_v41, %v179_v20  ;;  %v328_v56 = vadd.f32 %v327_v42, %v199_v26  ;;  %v427_v42 = vstv %s362_s3 }
 0x18c   :  { %v347_v44 = vmax.f32 %v313_v40, 0.0  ;;  %v351_v5 = vmax.f32 %v333_v59, 0.0 }
 0x18d   :  { %v346_v46 = vmax.f32 %v308_v43, 0.0  ;;  %v575_v47 = vpop.f32.mrb[2].mxu0  ;;  %v581_v48 = vpop.f32.mrb[2].mxu1  ;;  %v350_v0 = vmax.f32 %v328_v56, 0.0 }
 0x18e   :  { %v407_v49 = vmul.f32 %v374_v23, %v347_v44  ;;  %v462_v50 = vmul.f32 %v435_v35, %v347_v44  ;;  %v317_v51 = vpop.f32.mrb[3].mxu0  ;;  %v337_v52 = vpop.f32.mrb[3].mxu1  ;;  %v323_v57 = vadd.f32 %v575_v47, %v194_v21  ;;  %v343_v7 = vadd.f32 %v581_v48, %v214_v32 }
 0x18f   :  { %v406_v54 = vmul.f32 %v369_v24, %v346_v46  ;;  %v461_v55 = vmul.f32 %v431_v36, %v346_v46  ;;  %v318_v58 = vadd.f32 %v317_v51, %v189_v22  ;;  %v338_v4 = vadd.f32 %v337_v52, %v209_v30  ;;  %v459_v23 = vpop.permute.xlu0 %458 }
 0x190   :  { %v349_v62 = vmax.f32 %v323_v57, 0.0  ;;  %v410_v12 = vmul.f32 %v389_v29, %v350_v0  ;;  %v465_v13 = vmul.f32 %v447_v1, %v350_v0  ;;  %v411_v17 = vmul.f32 %v394_v31, %v351_v5 }
 0x191   :  { %v414_v60 = vadd.f32 %v407_v49, %v406_v54  ;;  %v469_v61 = vadd.f32 %v462_v50, %v461_v55  ;;  %v348_v63 = vmax.f32 %v318_v58, 0.0  ;;  %v352_v16 = vmax.f32 %v338_v4, 0.0 }
 0x192   :  { %v409_v8 = vmul.f32 %v384_v27, %v349_v62  ;;  %v464_v9 = vmul.f32 %v443_v53, %v349_v62  ;;  %v466_v19 = vmul.f32 %v451_v6, %v351_v5  ;;  %v353_v20 = vmax.f32 %v343_v7, 0.0 }
 0x193   :  { %v408_v2 = vmul.f32 %v379_v25, %v348_v63  ;;  %v463_v3 = vmul.f32 %v439_v45, %v348_v63  ;;  %v412_v24 = vmul.f32 %v399_v34, %v352_v16  ;;  %v467_v26 = vmul.f32 %v455_v18, %v352_v16 }
 0x194   :  { %v413_v27 = vmul.f32 %v404_v33, %v353_v20  ;;  %v468_v32 = vmul.f32 %v459_v23, %v353_v20  ;;  %v485_v33 = vstv %s536_s15  ;;  %v487_v47 = vstv %s537_s16 }
 0x195   :  { %v415_v10 = vadd.f32 %v414_v60, %v408_v2  ;;  %v470_v11 = vadd.f32 %v469_v61, %v463_v3 }
 0x197   :  { %v416_v14 = vadd.f32 %v415_v10, %v409_v8  ;;  %v471_v15 = vadd.f32 %v470_v11, %v464_v9 }
 0x199   :  { %v417_v21 = vadd.f32 %v416_v14, %v410_v12  ;;  %v472_v22 = vadd.f32 %v471_v15, %v465_v13 }
 0x19b   :  { %v418_v25 = vadd.f32 %v417_v21, %v411_v17  ;;  %v473_v28 = vadd.f32 %v472_v22, %v466_v19 }
 0x19d   :  { %v419_v30 = vadd.f32 %v418_v25, %v412_v24  ;;  %v474_v35 = vadd.f32 %v473_v28, %v467_v26 }
 0x19f   :  { %v420_v29 = vadd.f32 %v419_v30, %v413_v27  ;;  %v475_v36 = vadd.f32 %v474_v35, %v468_v32 }
 0x1a1   :  { %v421_v37 = vrot.slane %v420_v29, 4  ;;  %v476_v34 = vrot.slane %v475_v36, 4 }
 0x1a3   :  { %v422_v38 = vadd.f32 %v421_v37, %v420_v29  ;;  %v477_v45 = vadd.f32 %v476_v34, %v475_v36 }
 0x1a5   :  { %v423_v31 = vrot.slane %v422_v38, 2  ;;  %v478_v49 = vrot.slane %v477_v45, 2 }
 0x1a7   :  { %v424_v40 = vadd.f32 %v423_v31, %v422_v38  ;;  %v479_v53 = vadd.f32 %v478_v49, %v477_v45 }
 0x1a9   :  { %v425_v41 = vrot.slane %v424_v40, 1 }
 0x1ab   :  { %v426_v43 = vadd.f32 %v425_v41, %v424_v40 }
 0x1ad   :  { %v428_v44 = vadd.f32 %v427_v42, %v426_v43 }
 0x1af   :  { %615 = vtanh.f32 %v428_v44 }
 0x1b9   :  { %v616_v46 = vpop.eup %615 }
 0x1ba   :  { %v486_v48 = vmul.f32 %v616_v46, %v485_v33 }
 0x1bc   :  { %v488_v50 = vadd.f32 %v487_v47, %v486_v48 }
 0x1be   :  { %v489_v51 = vmul.f32 1.442695, %v488_v50  ;;  %v496_v52 = vsel %vm493_vm1, 0.0, %v488_v50 }
 0x1bf   :  { %497 = vst [vmem:[#allocation6] sm:$0x3] %v496_v52 }
 0x1c0   :  { %617 = vpow2.f32 %v489_v51 }
 0x1c1   :  { %642 = shalt.err (!%p639_p9)
}
 0x1c2   :  { %s643_s22 = scalar_lea.hbm %s904_s8, 32 }
 0x1c3   :  { %p644_p10 = scmp.ne.s32.totalorder %s904_s8, %s643_s22  ;;  %p647_p11 = scmp.lt.u32.totalorder %s643_s22, %s904_s8 }
 0x1c5   :  { %p649_p12 = pnand %p647_p11, %p644_p10 }
 0x1c7   :  { %652 = shalt.err (!%p649_p12)
}
 0x1c8   :  { %517 = dma.vmem_to_hbm [thread:$0]  %s515_s18, 32, %s904_s8, [#allocation7]   ;;  %v480_v54 = vrot.slane %v479_v53, 1  ;;  %v482_v56 = vstv %s535_s19 }
 0x1c9   :  { %s685_s27 = smov [#allocation5]  }
 0x1ca   :  { %v481_v55 = vadd.f32 %v480_v54, %v479_v53  ;;  %v618_v57 = vpop.eup %617  ;;  %s504_s0 = sshll.u32 %s685_s27, 4  ;;  %s505_s0 = int_to_ptr.vmem [resolvable:$true] %s504_s0 }
 0x1cb   :  { %v491_v59 = vmul.f32 %v618_v57, %v841_v39  ;;  %s653_s5 = scalar_lea.vmem %s505_s0, 32  ;;  %p658_p0 = scmp.lt.s32.totalorder %s505_s0, %s505_s0 }
 0x1cc   :  { %v483_v58 = vadd.f32 %v482_v56, %v481_v55  ;;  %p654_p13 = scmp.ne.s32.totalorder %s505_s0, %s653_s5  ;;  %p659_p1 = scmp.lt.s32.totalorder %s653_s5, %s653_s5 }
 0x1ce   :  { %v492_v60 = vadd.f32 %v491_v59, %v483_v58  ;;  %p660_p2 = por %p659_p1, %p658_p0 }
 0x1d0   :  { %v494_v61 = vsel %vm493_vm1, %v841_v39, %v492_v60  ;;  %p661_p3 = pnand %p660_p2, %p654_p13 }
 0x1d1   :  { %495 = vst [vmem:[#allocation5] sm:$0x3] %v494_v61 }
 0x1d2   :  { %664 = shalt.err (!%p661_p3)
}
 0x1d3   :  { %s665_s29 = scalar_lea.hbm %s903_s7, 32 }
 0x1d4   :  { %p666_p4 = scmp.ne.s32.totalorder %s903_s7, %s665_s29  ;;  %p669_p5 = scmp.lt.u32.totalorder %s665_s29, %s903_s7 }
 0x1d6   :  { %p671_p6 = pnand %p669_p5, %p666_p4 }
 0x1d8   :  { %674 = shalt.err (!%p671_p6)
}
 0x1d9   :  { %507 = dma.vmem_to_hbm [thread:$0]  %s505_s0, 32, %s903_s7, [#allocation3]  }
 0x1da   :  { %677 = dma.done.wait [#allocation3], 32  }
 0x1db   :  { %678 = vsyncadd [#allocation3], 4294967264 }
 0x1dc   :  { %679 = dma.done.wait [#allocation7], 32  }
 0x1dd   :  { %680 = vsyncadd [#allocation7], 4294967264 }
 0x1de   :  { %524 = vsyncpa [#allocation3], 1 }
 0x1df   :  { %525 = vsyncpa [#allocation7], 1 }
 0x1e0   :  { %526 = vsyncpa [#allocation4], 1 }

</bundles_post_ra>
